<compile_context>
chip_gen: v6e
topology: v6e:2x2x1
jax: 0.10.0
libtpu: 0.0.40
codegen_flags: <defaults>
</compile_context>

<pallas_src>
import jax
import jax.numpy as jnp
from jax.experimental import pallas as pl
from jax.experimental.pallas import tpu as pltpu


def _mgf_kernel(ab_ref, dist_ref, trans_ref, dyn_ref, out_ref, base_ref):
    # ab_ref: SMEM f32[2] = [alpha, beta]
    alpha = ab_ref[0]
    beta = ab_ref[1]

    # Precompute the static part once per column tile.  The batch axis is the
    # innermost grid axis, so program_id(1) == 0 marks the first visit of this
    # column tile (per core on megacore parts).
    @pl.when(pl.program_id(1) == 0)
    def _():
        base_ref[...] = (
            alpha * dist_ref[...].astype(jnp.float32)
            + beta * trans_ref[...].astype(jnp.float32)
        )

    gamma = 1.0 - alpha - beta
    # base_ref is (1, Lt); dyn/out are (Bt, Lt): single sublane-broadcast add.
    out_ref[...] = (
        base_ref[...] + gamma * dyn_ref[...].astype(jnp.float32)
    ).astype(out_ref.dtype)


def multi_graph_fusion(alpha, beta, a_dist, a_trans, a_dyn):
    """alpha, beta: scalars; a_dist, a_trans: [N, N]; a_dyn: [B, N, N]."""
    B, N, N2 = a_dyn.shape
    assert N == N2 and a_dist.shape == (N, N) and a_trans.shape == (N, N)
    M = N * N
    out_dtype = a_dyn.dtype

    # Free, contiguous reshapes to a lane-dense 2-D layout.
    dist2 = a_dist.reshape(1, M)
    trans2 = a_trans.reshape(1, M)
    dyn2 = a_dyn.reshape(B, M)

    # ---- tile selection --------------------------------------------------
    # Lane (column) tile: full flattened row when it fits comfortably,
    # otherwise a large multiple of 128 (lane-dense, unmasked stores).
    MAX_LANE_TILE = 65536  # 256 KiB of f32 per sublane row of a block
    lane_tile = M if M <= MAX_LANE_TILE else MAX_LANE_TILE

    # Batch (sublane) tile: either the full batch, or a multiple of 8 chosen so
    # each A_dyn block is a few MiB (keeps per-step overhead negligible while
    # staying well inside the default scoped-VMEM budget with double-buffering).
    bytes_per_row = lane_tile * 4  # f32 compute path
    target_block_bytes = 4 << 20   # ~4 MiB per dyn block
    rows = max(1, target_block_bytes // bytes_per_row)
    if rows >= B:
        batch_tile = B
    else:
        batch_tile = max(8, (rows // 8) * 8)

    n_col = pl.cdiv(M, lane_tile)
    n_bat = pl.cdiv(B, batch_tile)

    ab = jnp.stack([jnp.asarray(alpha, jnp.float32),
                    jnp.asarray(beta, jnp.float32)])

    out2 = pl.pallas_call(
        _mgf_kernel,
        out_shape=jax.ShapeDtypeStruct((B, M), out_dtype),
        # Batch innermost: the dist/trans column tiles (constant block index
        # along the batch axis) stay resident in VMEM across all batch steps.
        grid=(n_col, n_bat),
        in_specs=[
            pl.BlockSpec(memory_space=pltpu.MemorySpace.SMEM),            # [alpha, beta]
            pl.BlockSpec((1, lane_tile), lambda j, b: (0, j)),            # A_dist (shared)
            pl.BlockSpec((1, lane_tile), lambda j, b: (0, j)),            # A_trans (shared)
            pl.BlockSpec((batch_tile, lane_tile), lambda j, b: (b, j)),   # A_dyn
        ],
        out_specs=pl.BlockSpec((batch_tile, lane_tile), lambda j, b: (b, j)),
        scratch_shapes=[pltpu.VMEM((1, lane_tile), jnp.float32)],         # base tile
        compiler_params=pltpu.CompilerParams(
            dimension_semantics=("parallel", "arbitrary"),
        ),
    )(ab, dist2, trans2, dyn2)

    return out2.reshape(B, N, N)


def multi_graph_fusion_ref(alpha, beta, a_dist, a_trans, a_dyn):
    return alpha * a_dist + beta * a_trans + (1.0 - alpha - beta) * a_dyn


if __name__ == "__main__":
    key = jax.random.PRNGKey(0)
    k1, k2, k3, k4, k5, k6 = jax.random.split(key, 6)

    # Learnable parameters from nn.Parameter(torch.tensor(0.33)).
    alpha = jnp.float32(0.33)
    beta = jnp.float32(0.33)

    # --- small case (matches the module's typical tiny test shapes) --------
    B, N = 2, 16
    a_dist = jax.random.uniform(k1, (N, N), dtype=jnp.float32)
    a_trans = jax.random.uniform(k2, (N, N), dtype=jnp.float32)
    a_dyn = jax.random.uniform(k3, (B, N, N), dtype=jnp.float32)

    out = multi_graph_fusion(alpha, beta, a_dist, a_trans, a_dyn)
    out = jax.block_until_ready(out)
    ref = multi_graph_fusion_ref(alpha, beta, a_dist[None], a_trans[None], a_dyn)
    assert out.shape == (B, N, N)
    assert jnp.allclose(out, ref, atol=1e-5, rtol=1e-5), "mismatch vs reference (small)"

    # --- slightly larger case: exercises batch tiling + scratch reuse ------
    B2, N2 = 16, 96
    b_dist = jax.random.uniform(k4, (N2, N2), dtype=jnp.float32)
    b_trans = jax.random.uniform(k5, (N2, N2), dtype=jnp.float32)
    b_dyn = jax.random.uniform(k6, (B2, N2, N2), dtype=jnp.float32)

    out2 = multi_graph_fusion(alpha, beta, b_dist, b_trans, b_dyn)
    out2 = jax.block_until_ready(out2)
    ref2 = multi_graph_fusion_ref(alpha, beta, b_dist[None], b_trans[None], b_dyn)
    assert out2.shape == (B2, N2, N2)
    assert jnp.allclose(out2, ref2, atol=1e-5, rtol=1e-5), "mismatch vs reference (tiled)"

    print("KERNEL_OK")
</pallas_src>

<mosaic_0001>
module attributes {stable_mosaic.version = 11 : i64} {
  func.func @_mgf_kernel(%arg0: i32, %arg1: i32, %arg2: memref<2xf32, #tpu.memory_space<smem>>, %arg3: memref<1x256xf32, #tpu.memory_space<vmem>>, %arg4: memref<1x256xf32, #tpu.memory_space<vmem>>, %arg5: memref<2x256xf32, #tpu.memory_space<vmem>>, %arg6: memref<2x256xf32, #tpu.memory_space<vmem>>, %arg7: memref<1x256xf32, #tpu.memory_space<vmem>>) attributes {dimension_semantics = [#tpu.dimension_semantics<parallel>, #tpu.dimension_semantics<arbitrary>], iteration_bounds = array<i64: 1, 1>, scalar_prefetch = 0 : i64, scratch_operands = 1 : i64, tpu.core_type = #tpu.core_type<tc>, window_params = [{transform_indices = @transform_0, window_bounds = array<i64: 2>}, {transform_indices = @transform_1, window_bounds = array<i64: 1, 256>}, {transform_indices = @transform_2, window_bounds = array<i64: 1, 256>}, {transform_indices = @transform_3, window_bounds = array<i64: 2, 256>}, {transform_indices = @transform_4, window_bounds = array<i64: 2, 256>}]} {
    %c0 = arith.constant 0 : index
    %0 = memref.load %arg2[%c0] : memref<2xf32, #tpu.memory_space<smem>>
    %c1 = arith.constant 1 : index
    %1 = memref.load %arg2[%c1] : memref<2xf32, #tpu.memory_space<smem>>
    %c0_i32 = arith.constant 0 : i32
    %2 = arith.cmpi eq, %arg1, %c0_i32 : i32
    %3 = arith.extui %2 : i1 to i32
    %c0_i32_0 = arith.constant 0 : i32
    %4 = arith.cmpi ne, %3, %c0_i32_0 : i32
    scf.if %4 {
      %c0_7 = arith.constant 0 : index
      %c0_8 = arith.constant 0 : index
      %14 = vector.load %arg3[%c0_7, %c0_8] : memref<1x256xf32, #tpu.memory_space<vmem>>, vector<1x256xf32>
      %15 = vector.broadcast %0 : f32 to vector<1x256xf32>
      %16 = arith.mulf %15, %14 : vector<1x256xf32>
      %c0_9 = arith.constant 0 : index
      %c0_10 = arith.constant 0 : index
      %17 = vector.load %arg4[%c0_9, %c0_10] : memref<1x256xf32, #tpu.memory_space<vmem>>, vector<1x256xf32>
      %18 = vector.broadcast %1 : f32 to vector<1x256xf32>
      %19 = arith.mulf %18, %17 : vector<1x256xf32>
      %20 = arith.addf %16, %19 : vector<1x256xf32>
      %c0_11 = arith.constant 0 : index
      %c0_12 = arith.constant 0 : index
      %21 = vector.load %arg7[%c0_11, %c0_12] : memref<1x256xf32, #tpu.memory_space<vmem>>, vector<1x256xf32>
      tpu.vector_store %arg7[%c0_11, %c0_12], %20 {strides = array<i32>} : memref<1x256xf32, #tpu.memory_space<vmem>>, vector<1x256xf32>,
    } else {
    }
    %cst = arith.constant 1.000000e+00 : f32
    %5 = arith.subf %cst, %0 : f32
    %6 = arith.subf %5, %1 : f32
    %c0_1 = arith.constant 0 : index
    %c0_2 = arith.constant 0 : index
    %7 = vector.load %arg7[%c0_1, %c0_2] : memref<1x256xf32, #tpu.memory_space<vmem>>, vector<1x256xf32>
    %c0_3 = arith.constant 0 : index
    %c0_4 = arith.constant 0 : index
    %8 = vector.load %arg5[%c0_3, %c0_4] : memref<2x256xf32, #tpu.memory_space<vmem>>, vector<2x256xf32>
    %9 = vector.broadcast %6 : f32 to vector<2x256xf32>
    %10 = arith.mulf %9, %8 : vector<2x256xf32>
    %11 = vector.broadcast %7 : vector<1x256xf32> to vector<2x256xf32>
    %12 = arith.addf %11, %10 : vector<2x256xf32>
    %c0_5 = arith.constant 0 : index
    %c0_6 = arith.constant 0 : index
    %13 = vector.load %arg6[%c0_5, %c0_6] : memref<2x256xf32, #tpu.memory_space<vmem>>, vector<2x256xf32>
    tpu.vector_store %arg6[%c0_5, %c0_6], %12 {strides = array<i32>} : memref<2x256xf32, #tpu.memory_space<vmem>>, vector<2x256xf32>,
    return
  }
  func.func @transform_0(%arg0: i32, %arg1: i32) -> i32 {
    %c0_i32 = arith.constant 0 : i32
    %c0_i32_0 = arith.constant 0 : i32
    return %c0_i32 : i32
  }
  func.func @transform_1(%arg0: i32, %arg1: i32) -> (i32, i32) {
    %c0_i32 = arith.constant 0 : i32
    %c0_i32_0 = arith.constant 0 : i32
    return %c0_i32, %arg0 : i32, i32
  }
  func.func @transform_2(%arg0: i32, %arg1: i32) -> (i32, i32) {
    %c0_i32 = arith.constant 0 : i32
    %c0_i32_0 = arith.constant 0 : i32
    return %c0_i32, %arg0 : i32, i32
  }
  func.func @transform_3(%arg0: i32, %arg1: i32) -> (i32, i32) {
    %c0_i32 = arith.constant 0 : i32
    return %arg1, %arg0 : i32, i32
  }
  func.func @transform_4(%arg0: i32, %arg1: i32) -> (i32, i32) {
    %c0_i32 = arith.constant 0 : i32
    return %arg1, %arg0 : i32, i32
  }
}

</mosaic_0001>

<bundles_post_ra>
// kernel: tpu_custom_call.1
= control target key start
LH: loop header
LB: loop body
LE: loop exit
PB: predicated region body
PF: predicated region fallthrough
CT: control target
= control target key end

     0   :  { %9 = vsyncpa [#allocation6], 0  ;;  %s258_s0 = inlined_call_operand.hbm [shape: f32[2], index: 0, kind: input, shape index: {}]   ;;  %s259_s1 = inlined_call_operand.hbm [shape: f32[1,256], index: 1, kind: input, shape index: {}]   ;;  %s260_s2 = inlined_call_operand.hbm [shape: f32[1,256], index: 2, kind: input, shape index: {}]   ;;  %s261_s3 = inlined_call_operand.vmem [shape: f32[2,256], index: 3, kind: input, shape index: {}]   ;;  %s262_s4 = inlined_call_operand.hbm [shape: f32[2,256], index: 4, kind: output, shape index: {}]  }
   0x1   :  { %10 = vsyncpa [#allocation4], 0 }
   0x2   :  { %11 = vsyncpa [#allocation9], 0 }
   0x3   :  { %12 = vsyncpa [#allocation5], 0  ;;  %s213_s15 = smov [#allocation3]   ;;  %s214_s18 = smov [#allocation7]  }
   0x4   :  { %20 = dma.hbm_to_smem %s258_s0, 16, %s213_s15, [#allocation6]  }
   0x5   :  { %s27_s19 = sshll.u32 %s214_s18, 4  ;;  %s215_s20 = smov [#allocation8]   ;;  %s28_s19 = int_to_ptr.vmem [resolvable:$true] %s27_s19 }
   0x6   :  { %s37_s21 = sshll.u32 %s215_s20, 4  ;;  %s153_s22 = scalar_lea.vmem %s28_s19, 32  ;;  %s38_s21 = int_to_ptr.vmem [resolvable:$true] %s37_s21 }
   0x7   :  { %p154_p0 = scmp.ne.s32.totalorder %s28_s19, %s153_s22  ;;  %p158_p1 = scmp.lt.s32.totalorder %s28_s19, %s28_s19 }
   0x8   :  { %p159_p2 = scmp.lt.s32.totalorder %s153_s22, %s153_s22 }
   0xa   :  { %p160_p3 = por %p159_p2, %p158_p1 }
   0xc   :  { %p161_p4 = pnand %p160_p3, %p154_p0 }
   0xe   :  { %164 = shalt.err (!%p161_p4)
}
   0xf   :  { %30 = dma.hbm_to_vmem [thread:$0]  %s259_s1, 32, %s28_s19, [#allocation4]  }
  0x10   :  { %s173_s25 = scalar_lea.vmem %s38_s21, 32  ;;  %p178_p6 = scmp.lt.s32.totalorder %s38_s21, %s38_s21 }
  0x11   :  { %p174_p5 = scmp.ne.s32.totalorder %s38_s21, %s173_s25  ;;  %p179_p7 = scmp.lt.s32.totalorder %s173_s25, %s173_s25 }
  0x13   :  { %p180_p8 = por %p179_p7, %p178_p6 }
  0x15   :  { %p181_p9 = pnand %p180_p8, %p174_p5 }
  0x17   :  { %184 = shalt.err (!%p181_p9)
}
  0x18   :  { %40 = dma.hbm_to_vmem [thread:$0]  %s260_s2, 32, %s38_s21, [#allocation9]  }
  0x19   :  { %205 = dma.done.wait [#allocation6], 16  }
  0x1a   :  { %206 = vsyncadd [#allocation6], 4294967280 }
  0x1b   :  { %207 = dma.done.wait [#allocation4], 32  }
  0x1c   :  { %208 = vsyncadd [#allocation4], 4294967264 }
  0x1d   :  { %209 = dma.done.wait [#allocation9], 32  }
  0x1e   :  { %210 = vsyncadd [#allocation9], 4294967264 }
  0x1f   :  { %52 = sfence }
  0x20   :  { %s53_s1 = sld [smem:[#allocation3]]  ;;  %v216_v0 = vmov 1983009808   ;;  %v59_v2 = vld [vmem:[#allocation7] sm:$0x3]  ;;  %v66_v3 = vlaneseq  ;;  %s217_s5 = smov [#allocation10]  }
  0x21   :  { %s130_s27 = sld [smem:[#allocation3 + $0x1]]  ;;  %v90_v1 = vunpack.c.l.s4 %v216_v0  ;;  %v62_v4 = vld [vmem:[#allocation8] sm:$0x3]  ;;  %v74_v11 = vld [vmem:[%s261_s3] sm:$0xf]  ;;  %s119_s6 = sshll.u32 %s217_s5, 4  ;;  %s120_s6 = int_to_ptr.vmem [resolvable:$true] %s119_s6 }
  0x22   :  { %v79_v6 = vshrl.u32 %v66_v3, 7  ;;  %vm68_vm0 = vcmp.lt.s32.totalorder %v66_v3, 256  ;;  %s185_s3 = scalar_lea.vmem %s120_s6, 64  ;;  %p190_p11 = scmp.lt.s32.totalorder %s120_s6, %s120_s6 }
  0x23   :  { %v91_v7 = vunpack.c.0.s8 %v90_v1  ;;  %p186_p10 = scmp.ne.s32.totalorder %s120_s6, %s185_s3  ;;  %p191_p12 = scmp.lt.s32.totalorder %s185_s3, %s185_s3 }
  0x24   :  { %v80_v17 = vsub.s32 0, %v79_v6  ;;  %v84_v18 = vsub.s32 1, %v79_v6 }
  0x25   :  { %v94_v14 = vsub.s32 %v91_v7, %v79_v6  ;;  %p192_p13 = por %p191_p12, %p190_p11 }
  0x26   :  { %v60_v5 = vstv %s53_s1  ;;  %s71_s28 = ssub.f32 1.0, %s53_s1 }
  0x27   :  { %v61_v8 = vmul.f32 %v60_v5, %v59_v2  ;;  %v63_v9 = vstv %s130_s27  ;;  %p193_p0 = pnand %p192_p13, %p186_p10 }
  0x28   :  { %v64_v10 = vmul.f32 %v63_v9, %v62_v4  ;;  %s72_s2 = ssub.f32 %s71_s28, %s130_s27 }
  0x2a   :  { %v65_v12 = vadd.f32 %v64_v10, %v61_v8  ;;  %v75_v13 = vstv %s72_s2 }
  0x2b   :  { %v76_v15 = vmul.f32 %v75_v13, %v74_v11 }
  0x2c   :  { %70 = vst.msk [vmem:[#allocation2] sm:$0x3] %vm68_vm0, %v65_v12 }
  0x2d   :  { %v95_v16 = vrot.slane %v76_v15, %v94_v14 }
  0x2f   :  { %v96_v19 = vcombine.high %v95_v16, %v95_v16 }
  0x33   :  { %v73_v20 = vld [vmem:[#allocation2] sm:$0x3] }
  0x34   :  { %v81_v21 = vrot.slane %v73_v20, %v80_v17  ;;  %v85_v22 = vrot.slane %v73_v20, %v84_v18 }
  0x36   :  { %v99_v23 = vadd.f32 %v95_v16, %v81_v21  ;;  %v100_v24 = vadd.f32 %v96_v19, %v85_v22 }
  0x38   :  { %v103_v25 = vcombine.low %v99_v23, %v100_v24 }
  0x3a   :  { %131 = vst.sshfl [vmem:[#allocation10] sm:$0x33 pattern:$0x76325410] %v103_v25 }
  0x3b   :  { %196 = shalt.err (!%p193_p0)
}
  0x3c   :  { %122 = dma.vmem_to_hbm [thread:$0]  %s120_s6, 64, %s262_s4, [#allocation5]  }
  0x3d   :  { %211 = dma.done.wait [#allocation5], 64  }
  0x3e   :  { %212 = vsyncadd [#allocation5], 4294967232 }
  0x3f   :  { %126 = vsyncpa [#allocation4], 1 }
  0x40   :  { %127 = vsyncpa [#allocation9], 1 }
  0x41   :  { %128 = vsyncpa [#allocation5], 1 }
  0x42   :  { %129 = vsyncpa [#allocation6], 1 }

</bundles_post_ra>
